<compile_context>
chip_gen: v6e
topology: v6e:2x2x1
jax: 0.10.0
libtpu: 0.0.40
codegen_flags: <defaults>
</compile_context>

<pallas_src>
import jax
import jax.numpy as jnp
from jax.experimental import pallas as pl
from jax.experimental.pallas import tpu as pltpu


def _bilinear_attn_kernel(y_ref, w_t_ref, b_ref, x_ref, mask_ref, alpha_ref):
    """Per grid step (one batch block):
       y_ref    : [Bb, Dy]      w_t_ref : [Dy, Dx]     b_ref : [1, Dx]
       x_ref    : [Bb, L, Dx]   mask_ref: [Bb, L]      alpha_ref: [Bb, L]
    """
    # Linear projection Wy = y @ W^T + b  (MXU, f32 accumulation).
    wy = jnp.dot(y_ref[...], w_t_ref[...],
                 preferred_element_type=jnp.float32) + b_ref[...]      # [Bb, Dx]

    # Bilinear scores: xWy[b, l] = sum_d x[b, l, d] * Wy[b, d].
    x = x_ref[...].astype(jnp.float32)                                 # [Bb, L, Dx]
    scores = jnp.sum(x * wy[:, None, :], axis=-1)                      # [Bb, L]

    # Mask (1 = padding) and numerically-stable softmax over L.
    masked = mask_ref[...] != 0
    scores = jnp.where(masked, jnp.float32(-1e30), scores)
    m = jnp.max(scores, axis=-1, keepdims=True)                        # [Bb, 1]
    e = jnp.where(masked, jnp.float32(0.0), jnp.exp(scores - m))       # exact 0 at pads
    s = jnp.sum(e, axis=-1, keepdims=True)                             # [Bb, 1]
    alpha_ref[...] = (e / s).astype(alpha_ref.dtype)


def bilinear_seq_attn(x, y, x_mask, weight, bias, *, batch_block=None):
    """x: [B, L, x_size]; y: [B, y_size]; x_mask: [B, L] (1 = pad);
       weight: [x_size, y_size]; bias: [x_size].  Returns alpha: [B, L]."""
    B, L, d_x = x.shape
    d_y = y.shape[1]
    assert weight.shape == (d_x, d_y) and bias.shape == (d_x,)

    if batch_block is None:
        batch_block = B if B <= 8 else 8   # keep (8, 128)-friendly blocks for big B

    w_t = jnp.transpose(weight)            # [Dy, Dx]
    b2 = bias.reshape(1, d_x)              # [1, Dx]
    mask = x_mask.astype(jnp.int32)

    grid = (pl.cdiv(B, batch_block),)

    return pl.pallas_call(
        _bilinear_attn_kernel,
        out_shape=jax.ShapeDtypeStruct((B, L), x.dtype),
        grid_spec=pltpu.PrefetchScalarGridSpec(
            num_scalar_prefetch=0,
            grid=grid,
            in_specs=[
                pl.BlockSpec((batch_block, d_y), lambda i: (i, 0)),        # y
                pl.BlockSpec((d_y, d_x), lambda i: (0, 0)),                # W^T
                pl.BlockSpec((1, d_x), lambda i: (0, 0)),                  # bias
                pl.BlockSpec((batch_block, L, d_x), lambda i: (i, 0, 0)),  # x
                pl.BlockSpec((batch_block, L), lambda i: (i, 0)),          # mask
            ],
            out_specs=pl.BlockSpec((batch_block, L), lambda i: (i, 0)),    # alpha
        ),
        compiler_params=pltpu.CompilerParams(
            dimension_semantics=("parallel",)),
    )(y, w_t, b2, x, mask)


# ----------------------------- pure-JAX reference -----------------------------
def ref_bilinear_seq_attn(x, y, x_mask, weight, bias):
    wy = y @ weight.T + bias                              # [B, Dx]
    xwy = jnp.einsum('bld,bd->bl', x, wy)                 # [B, L]
    xwy = jnp.where(x_mask != 0, -jnp.inf, xwy)
    return jax.nn.softmax(xwy, axis=-1)
# ------------------------------------------------------------------------------


if __name__ == "__main__":
    B, L = 2, 16
    x_size, y_size = 32, 48

    key = jax.random.PRNGKey(0)
    kx, ky, kw, kb = jax.random.split(key, 4)
    x = jax.random.normal(kx, (B, L, x_size), jnp.float32)
    y = jax.random.normal(ky, (B, y_size), jnp.float32)
    bound = 1.0 / jnp.sqrt(y_size)
    weight = jax.random.uniform(kw, (x_size, y_size), jnp.float32, -bound, bound)
    bias = jax.random.uniform(kb, (x_size,), jnp.float32, -bound, bound)

    # x_mask: 1 = padding.  Batch 0 unpadded; batch 1 has its last 5 positions padded.
    x_mask = jnp.zeros((B, L), jnp.int32).at[1, L - 5:].set(1)

    alpha = bilinear_seq_attn(x, y, x_mask, weight, bias)
    alpha = jax.block_until_ready(alpha)
    assert alpha.shape == (B, L), alpha.shape

    ref = ref_bilinear_seq_attn(x, y, x_mask, weight, bias)
    assert jnp.allclose(alpha, ref, atol=1e-5, rtol=1e-5), float(
        jnp.max(jnp.abs(alpha - ref)))
    # Rows must sum to 1; masked positions must be exactly zero.
    assert jnp.allclose(alpha.sum(-1), 1.0, atol=1e-5)
    assert float(jnp.abs(alpha[1, L - 5:]).max()) == 0.0

    print("KERNEL_OK")
</pallas_src>

<mosaic_0001>
module attributes {stable_mosaic.version = 11 : i64} {
  func.func @_bilinear_attn_kernel(%arg0: i32, %arg1: memref<2x48xf32, #tpu.memory_space<vmem>>, %arg2: memref<48x32xf32, #tpu.memory_space<vmem>>, %arg3: memref<1x32xf32, #tpu.memory_space<vmem>>, %arg4: memref<2x16x32xf32, #tpu.memory_space<vmem>>, %arg5: memref<2x16xi32, #tpu.memory_space<vmem>>, %arg6: memref<2x16xf32, #tpu.memory_space<vmem>>) attributes {dimension_semantics = [#tpu.dimension_semantics<parallel>], iteration_bounds = array<i64: 1>, scalar_prefetch = 0 : i64, scratch_operands = 0 : i64, tpu.core_type = #tpu.core_type<tc>, window_params = [{transform_indices = @transform_0, window_bounds = array<i64: 2, 48>}, {pipeline_mode = #tpu.pipeline_mode<synchronous>, transform_indices = @transform_1, window_bounds = array<i64: 48, 32>}, {pipeline_mode = #tpu.pipeline_mode<synchronous>, transform_indices = @transform_2, window_bounds = array<i64: 1, 32>}, {transform_indices = @transform_3, window_bounds = array<i64: 2, 16, 32>}, {transform_indices = @transform_4, window_bounds = array<i64: 2, 16>}, {transform_indices = @transform_5, window_bounds = array<i64: 2, 16>}]} {
    %c0 = arith.constant 0 : index
    %c0_0 = arith.constant 0 : index
    %0 = vector.load %arg1[%c0, %c0_0] : memref<2x48xf32, #tpu.memory_space<vmem>>, vector<2x48xf32>
    %c0_1 = arith.constant 0 : index
    %c0_2 = arith.constant 0 : index
    %1 = vector.load %arg2[%c0_1, %c0_2] : memref<48x32xf32, #tpu.memory_space<vmem>>, vector<48x32xf32>
    %cst = arith.constant dense<0.000000e+00> : vector<2x32xf32>
    %2 = tpu.matmul %0, %1, %cst {dimension_numbers = #tpu.dot_dimension_numbers<[1], [0], [0], [1], [0, 0, 1, 1], [], []>} : vector<2x48xf32>, vector<48x32xf32>, vector<2x32xf32> -> vector<2x32xf32>
    %c0_3 = arith.constant 0 : index
    %c0_4 = arith.constant 0 : index
    %3 = vector.load %arg3[%c0_3, %c0_4] : memref<1x32xf32, #tpu.memory_space<vmem>>, vector<1x32xf32>
    %4 = vector.broadcast %3 : vector<1x32xf32> to vector<2x32xf32>
    %5 = arith.addf %2, %4 : vector<2x32xf32>
    %c0_5 = arith.constant 0 : index
    %c0_6 = arith.constant 0 : index
    %c0_7 = arith.constant 0 : index
    %6 = vector.load %arg4[%c0_5, %c0_6, %c0_7] : memref<2x16x32xf32, #tpu.memory_space<vmem>>, vector<2x16x32xf32>
    %7 = vector.shape_cast %5 : vector<2x32xf32> to vector<2x1x32xf32>
    %8 = vector.broadcast %7 : vector<2x1x32xf32> to vector<2x16x32xf32>
    %9 = arith.mulf %6, %8 : vector<2x16x32xf32>
    %cst_8 = arith.constant dense<0.000000e+00> : vector<2x16xf32>
    %10 = vector.multi_reduction <add>, %9, %cst_8 [2] : vector<2x16x32xf32> to vector<2x16xf32>
    %c0_9 = arith.constant 0 : index
    %c0_10 = arith.constant 0 : index
    %11 = vector.load %arg5[%c0_9, %c0_10] : memref<2x16xi32, #tpu.memory_space<vmem>>, vector<2x16xi32>
    %c0_i32 = arith.constant 0 : i32
    %12 = vector.broadcast %c0_i32 : i32 to vector<2x16xi32>
    %13 = arith.cmpi ne, %11, %12 : vector<2x16xi32>
    %cst_11 = arith.constant -1.000000e+30 : f32
    %14 = vector.broadcast %cst_11 : f32 to vector<2x16xf32>
    %15 = arith.select %13, %14, %10 : vector<2x16xi1>, vector<2x16xf32>
    %cst_12 = arith.constant dense<0xFF800000> : vector<2xf32>
    %16 = vector.multi_reduction <maximumf>, %15, %cst_12 [1] : vector<2x16xf32> to vector<2xf32>
    %17 = vector.shape_cast %16 : vector<2xf32> to vector<2x1xf32>
    %18 = vector.broadcast %17 : vector<2x1xf32> to vector<2x16xf32>
    %19 = arith.subf %15, %18 : vector<2x16xf32>
    %20 = math.exp %19 : vector<2x16xf32>
    %cst_13 = arith.constant 0.000000e+00 : f32
    %21 = vector.broadcast %cst_13 : f32 to vector<2x16xf32>
    %22 = arith.select %13, %21, %20 : vector<2x16xi1>, vector<2x16xf32>
    %cst_14 = arith.constant dense<0.000000e+00> : vector<2xf32>
    %23 = vector.multi_reduction <add>, %22, %cst_14 [1] : vector<2x16xf32> to vector<2xf32>
    %24 = vector.shape_cast %23 : vector<2xf32> to vector<2x1xf32>
    %25 = vector.broadcast %24 : vector<2x1xf32> to vector<2x16xf32>
    %26 = arith.divf %22, %25 : vector<2x16xf32>
    %c0_15 = arith.constant 0 : index
    %c0_16 = arith.constant 0 : index
    %27 = vector.load %arg6[%c0_15, %c0_16] : memref<2x16xf32, #tpu.memory_space<vmem>>, vector<2x16xf32>
    tpu.vector_store %arg6[%c0_15, %c0_16], %26 {strides = array<i32>} : memref<2x16xf32, #tpu.memory_space<vmem>>, vector<2x16xf32>,
    return
  }
  func.func @transform_0(%arg0: i32) -> (i32, i32) {
    %c0_i32 = arith.constant 0 : i32
    %c0_i32_0 = arith.constant 0 : i32
    return %arg0, %c0_i32 : i32, i32
  }
  func.func @transform_1(%arg0: i32) -> (i32, i32) {
    %c0_i32 = arith.constant 0 : i32
    %c0_i32_0 = arith.constant 0 : i32
    %c0_i32_1 = arith.constant 0 : i32
    return %c0_i32, %c0_i32_0 : i32, i32
  }
  func.func @transform_2(%arg0: i32) -> (i32, i32) {
    %c0_i32 = arith.constant 0 : i32
    %c0_i32_0 = arith.constant 0 : i32
    %c0_i32_1 = arith.constant 0 : i32
    return %c0_i32, %c0_i32_0 : i32, i32
  }
  func.func @transform_3(%arg0: i32) -> (i32, i32, i32) {
    %c0_i32 = arith.constant 0 : i32
    %c0_i32_0 = arith.constant 0 : i32
    %c0_i32_1 = arith.constant 0 : i32
    return %arg0, %c0_i32, %c0_i32_0 : i32, i32, i32
  }
  func.func @transform_4(%arg0: i32) -> (i32, i32) {
    %c0_i32 = arith.constant 0 : i32
    %c0_i32_0 = arith.constant 0 : i32
    return %arg0, %c0_i32 : i32, i32
  }
  func.func @transform_5(%arg0: i32) -> (i32, i32) {
    %c0_i32 = arith.constant 0 : i32
    %c0_i32_0 = arith.constant 0 : i32
    return %arg0, %c0_i32 : i32, i32
  }
}

</mosaic_0001>

<bundles_post_ra>
// kernel: tpu_custom_call.1
= control target key start
LH: loop header
LB: loop body
LE: loop exit
PB: predicated region body
PF: predicated region fallthrough
CT: control target
= control target key end

     0   :  { %v277_v1 = vmov 0.0   ;;  %vm278_vm0 = vmmov 0   ;;  %s356_s0 = inlined_call_operand.vmem [shape: f32[2,48], index: 0, kind: input, shape index: {}]   ;;  %s357_s1 = inlined_call_operand.vmem [shape: f32[48,32], index: 1, kind: input, shape index: {}]   ;;  %s358_s2 = inlined_call_operand.vmem [shape: f32[1,32], index: 2, kind: input, shape index: {}]   ;;  %s359_s3 = inlined_call_operand.vmem [shape: f32[2,16,32], index: 3, kind: input, shape index: {}]   ;;  %s360_s4 = inlined_call_operand.vmem [shape: s32[2,16], index: 4, kind: input, shape index: {}]   ;;  %s361_s5 = inlined_call_operand.hbm [shape: f32[2,16], index: 5, kind: output, shape index: {}]  }
   0x1   :  { %v27_v0 = vld [vmem:[%s357_s1 + $0x28] sm:$0xff]  ;;  %232 = vmatprep.subr.mxu0 %v277_v1  ;;  %v26_v2 = vld [vmem:[%s357_s1 + $0x20] sm:$0xff]  ;;  %244 = vmatprep.mubr.msk.f32.mxu0 %vm278_vm0, %v277_v1 }
   0x2   :  { %233 = vmatpush3.msra.mxu0 %v27_v0 }
   0x3   :  { %10 = vsyncpa [#allocation3], 0  ;;  %234 = vmatprep.subr.mxu0 %v277_v1  ;;  %v25_v3 = vld [vmem:[%s357_s1 + $0x18] sm:$0xff]  ;;  %v24_v4 = vld [vmem:[%s357_s1 + $0x10] sm:$0xff]  ;;  %vm35_vm1 = vcmask 392192   ;;  %v117_v10 = vlaneseq  ;;  %vm150_vm2 = vcmask 261120  }
   0x4   :  { %235 = vmatpush3.msra.mxu0 %v26_v2  ;;  %v23_v5 = vld [vmem:[%s357_s1 + $0x8] sm:$0xff]  ;;  %v22_v6 = vld [vmem:[%s357_s1] sm:$0xff]  ;;  %v279_v8 = vmov 1966171168   ;;  %v111_v25 = vld [vmem:[%s359_s3 + $0x10] sm:$0xff]  ;;  %vm180_vm3 = vcmask 130112  }
   0x5   :  { %236 = vmatprep.subr.mxu0 %v277_v1  ;;  %v21_v7 = vld [vmem:[%s356_s0] sm:$0x3]  ;;  %v115_v9 = vunpack.c.l.s4 %v279_v8  ;;  %v118_v12 = vshrl.u32 %v117_v10, 7  ;;  %v110_v26 = vld [vmem:[%s359_s3 + $0x8] sm:$0xff]  ;;  %v112_v29 = vld [vmem:[%s359_s3 + $0x18] sm:$0xff]  ;;  %v170_v37 = vand.u32 127, %v117_v10 }
   0x6   :  { %237 = vmatpush3.msra.mxu0 %v25_v3  ;;  %v223_v13 = vld [vmem:[%s358_s2] ss:$0 sm:$0xff]  ;;  %vm191_vm4 = vcmask 1041409   ;;  %vm195_vm6 = vcmask 123904  }
   0x7   :  { %238 = vmatprep.subr.mxu0 %v277_v1  ;;  %v116_v11 = vunpack.c.0.s8 %v115_v9  ;;  %v138_v19 = vsub.s32 0, %v118_v12  ;;  %v109_v22 = vld [vmem:[%s359_s3] sm:$0xff]  ;;  %v175_v38 = vadd.s32 4294967288, %v170_v37  ;;  %v173_v42 = vsub.s32 %v170_v37, %v118_v12 }
   0x8   :  { %239 = vmatpush3.msra.mxu0 %v24_v4  ;;  %v163_v45 = vld [vmem:[%s360_s4] sm:$0x3]  ;;  %s280_s4 = smov [#allocation2]  }
   0x9   :  { %240 = vmatprep.subr.mxu0 %v277_v1  ;;  %v119_v14 = vsub.s32 %v116_v11, %v118_v12  ;;  %v178_v40 = vsub.s32 %v175_v38, %v118_v12  ;;  %vm164_vm5 = vcmp.ne.s32.totalorder %v163_v45, 0  ;;  %s215_s15 = sshll.u32 %s280_s4, 4  ;;  %s216_s15 = int_to_ptr.vmem [resolvable:$true] %s215_s15 }
   0xa   :  { %241 = vmatpush3.msra.mxu0 %v23_v5  ;;  %s255_s16 = scalar_lea.vmem %s216_s15, 32  ;;  %p260_p1 = scmp.lt.s32.totalorder %s216_s15, %s216_s15 }
   0xb   :  { %242 = vmatprep.subr.mxu0 %v277_v1  ;;  %p256_p0 = scmp.ne.s32.totalorder %s216_s15, %s255_s16  ;;  %p261_p2 = scmp.lt.s32.totalorder %s255_s16, %s255_s16 }
   0xc   :  { %243 = vmatpush3.msra.mxu0 %v22_v6 }
   0xd   :  { %245 = vmatmul.mubr.msk.f32.vlgmr.msra.gmra.mxu0 %vm35_vm1, %v21_v7  ;;  %p262_p3 = por %p261_p2, %p260_p1 }
   0xf   :  { %p263_p4 = pnand %p262_p3, %p256_p0 }
  0xcd   :  { %v105_v15 = vpop.f32.mrf.mxu0 }
  0xce   :  { %v106_v16 = vadd.f32 %v223_v13, %v105_v15 }
  0xcf   :  { %v246_v17 = vpop.f32.mrf.mxu0 }
  0xd0   :  { %v120_v18 = vrot.slane %v106_v16, %v119_v14 }
  0xd2   :  { %v121_v20 = vcombine.high %v120_v18, %v120_v18  ;;  %v128_v21 = vrot.slane %v120_v18, %v119_v14 }
  0xd4   :  { %v139_v23 = vrot.slane %v128_v21, %v138_v19  ;;  %v135_v24 = vrot.slane %v121_v20, %v119_v14 }
  0xd6   :  { %v146_v27 = vmul.f32 %v139_v23, %v109_v22  ;;  %v143_v28 = vrot.slane %v135_v24, %v138_v19  ;;  %v147_v32 = vmul.f32 %v139_v23, %v110_v26 }
  0xd8   :  { %v151_v30 = vsel %vm150_vm2, %v146_v27, 0.0  ;;  %v148_v31 = vmul.f32 %v143_v28, %v111_v25  ;;  %v149_v34 = vmul.f32 %v143_v28, %v112_v29  ;;  %v154_v35 = vsel %vm150_vm2, %v147_v32, 0.0 }
  0xd9   :  { %152 = vadd.xlane.f32.xlu0 %v151_v30 }
  0xda   :  { %v157_v33 = vsel %vm150_vm2, %v148_v31, 0.0  ;;  %v160_v36 = vsel %vm150_vm2, %v149_v34, 0.0 }
  0xdb   :  { %158 = vadd.xlane.f32.xlu1 %v157_v33 }
  0xdd   :  { %155 = vadd.xlane.f32.xlu0 %v154_v35 }
  0xdf   :  { %161 = vadd.xlane.f32.xlu1 %v160_v36 }
 0x162   :  { %v153_v39 = vpop.xlane.xlu0 %152 }
 0x163   :  { %v174_v47 = vrot.slane %v153_v39, %v173_v42 }
 0x164   :  { %v159_v41 = vpop.xlane.xlu1 %158 }
 0x165   :  { %v185_v48 = vrot.slane %v159_v41, %v173_v42 }
 0x166   :  { %v156_v43 = vpop.xlane.xlu0 %155 }
 0x167   :  { %v179_v44 = vrot.slane %v156_v43, %v178_v40 }
 0x168   :  { %v162_v46 = vpop.xlane.xlu1 %161 }
 0x169   :  { %v189_v49 = vrot.slane %v162_v46, %v178_v40  ;;  %v181_v50 = vsel %vm180_vm3, %v179_v44, %v174_v47 }
 0x16b   :  { %v190_v51 = vsel %vm180_vm3, %v189_v49, %v185_v48 }
 0x16c   :  { %v192_v52 = vsel %vm191_vm4, %v190_v51, %v181_v50 }
 0x16d   :  { %v194_v53 = vsel %vm164_vm5, -1e+30, %v192_v52 }
 0x16e   :  { %v196_v54 = vsel %vm195_vm6, %v194_v53, -inf }
 0x16f   :  { %197 = vmax.xlane.f32.xlu0 %v196_v54 }
 0x1f8   :  { %v198_v55 = vpop.xlane.xlu0 %197 }
 0x1f9   :  { %v199_v56 = vsub.f32 %v194_v53, %v198_v55 }
 0x1fb   :  { %v200_v57 = vmul.f32 1.442695, %v199_v56 }
 0x1fd   :  { %251 = vpow2.f32 %v200_v57 }
 0x20a   :  { %v252_v58 = vpop.eup %251 }
 0x20b   :  { %v202_v59 = vsel %vm164_vm5, 0.0, %v252_v58 }
 0x20c   :  { %v203_v60 = vsel %vm195_vm6, %v202_v59, 0.0 }
 0x20d   :  { %204 = vadd.xlane.f32.xlu1 %v203_v60 }
 0x296   :  { %v205_v61 = vpop.xlane.xlu1 %204 }
 0x297   :  { %253 = vrcp.f32 %v205_v61 }
 0x2a4   :  { %v254_v62 = vpop.eup %253 }
 0x2a5   :  { %v207_v63 = vmul.f32 %v254_v62, %v202_v59 }
 0x2a7   :  { %208 = vst.msk [vmem:[#allocation2] sm:$0x3] %vm195_vm6, %v207_v63 }
 0x2a8   :  { %266 = shalt.err (!%p263_p4)
}
 0x2a9   :  { %218 = dma.vmem_to_hbm [thread:$0]  %s216_s15, 32, %s361_s5, [#allocation3]  }
 0x2aa   :  { %275 = dma.done.wait [#allocation3], 32  }
 0x2ab   :  { %276 = vsyncadd [#allocation3], 4294967264 }
 0x2ac   :  { %222 = vsyncpa [#allocation3], 1 }

</bundles_post_ra>
